<compile_context>
chip_gen: v5e
topology: v5e:2x2
jax: 0.10.0
libtpu: 0.0.40
codegen_flags: <defaults>
</compile_context>

<pallas_src>
import jax
import jax.numpy as jnp
from jax.experimental import pallas as pl
from jax.experimental.pallas import tpu as pltpu

_LANE = 128
_SUBLANE = 8
_MAX_LANE_WIDTH = 8192          # widest lane (last) dim for the 2D slab view


# ----------------------------------------------------------------------------
# Recommended path: Identity is free.  Return x.  O(0) work, bit-exact.
# ----------------------------------------------------------------------------
def identity(x):
    """Identity.forward(x) = x."""
    return x


# ----------------------------------------------------------------------------
# Zero-DMA Pallas variant: no grid, raw HBM refs, output aliased onto input.
# ----------------------------------------------------------------------------
def _identity_noop_kernel(x_ref, o_ref):
    del x_ref
    # The output buffer is aliased onto the input buffer, so it already holds
    # x.  touch() pins a read/write dependency on o_ref so the aliased output
    # is treated as produced by this kernel; no DMA is issued, 0 bytes move.
    pltpu.touch(o_ref)


def identity_pallas(x):
    """Pallas-wrapped Identity with zero HBM traffic.

    memory_space=pl.ANY hands the kernel raw HBM refs (no BlockSpec DMA) and
    input_output_aliases={0: 0} maps the output onto the input buffer.
    Note: the alias only avoids a copy entirely when the caller donates x
    (jax.jit donate_argnums / no live reference to x afterwards); otherwise
    XLA inserts a single defensive copy — still no worse than any
    copy-through-VMEM kernel.
    """
    if x.size == 0:
        return x
    try:
        return pl.pallas_call(
            _identity_noop_kernel,
            out_shape=jax.ShapeDtypeStruct(x.shape, x.dtype),
            in_specs=[pl.BlockSpec(memory_space=pl.ANY)],
            out_specs=pl.BlockSpec(memory_space=pl.ANY),
            input_output_aliases={0: 0},
            compiler_params=pltpu.CompilerParams(has_side_effects=True),
        )(x)
    except Exception:
        # Graceful degradation: `return x` is bit-exact Identity semantics.
        return x


# ----------------------------------------------------------------------------
# Tiled copy variant (only if the caller requires a fresh output buffer).
# ----------------------------------------------------------------------------
def _identity_copy_kernel(x_ref, o_ref):
    o_ref[...] = x_ref[...]


def _target_block_bytes():
    """Per-generation block size.

    v6e/v7x: ~4 MiB blocks (at 1.4-3.2 TB/s the ~0.35 us per-step cost is a
    noticeable fraction of a 2 MiB block's read+write, so bigger tiles win;
    in+out double-buffered footprint = 16 MiB, within every chip's VMEM).
    v5e: ~2 MiB (already at the ~0.82 TB/s roofline; larger only adds VMEM
    pressure).
    """
    try:
        kind = jax.devices()[0].device_kind.lower()
    except Exception:
        kind = ""
    if "v5 lite" in kind or "v5e" in kind:
        return 2 * 1024 * 1024
    return 4 * 1024 * 1024


def _choose_layout(total, itemsize, block_bytes):
    """Pick (rows, lane, tile_rows) for a lane-dense (rows, lane) 2D view.

    Returns None when the flat size is not a multiple of 128 lanes; the
    caller then just returns x (which is exactly Identity anyway).
    """
    if total % _LANE != 0:
        return None
    # Widest power-of-two lane dim (multiple of 128, <= 8192) dividing total
    # while keeping at least 8 rows where possible -> unmasked wide `vst`s.
    lane = _LANE
    while (lane * 2 <= _MAX_LANE_WIDTH
           and total % (lane * 2) == 0
           and total // (lane * 2) >= _SUBLANE):
        lane *= 2
    rows = total // lane

    # Rows per ~block_bytes block, rounded down to a sublane multiple.
    rows_per_block = max(_SUBLANE,
                         (block_bytes // (lane * itemsize)) // _SUBLANE * _SUBLANE)
    tile_rows = min(rows, rows_per_block)
    if tile_rows < rows:
        # Non-full block -> must be (8,128)-aligned; ragged tail is masked.
        tile_rows = max(_SUBLANE, (tile_rows // _SUBLANE) * _SUBLANE)
    else:
        # Full-extent single block: split into >=2 parallel steps so v7x's
        # two TensorCores both issue DMAs (no-op on 1-TC v5e/v6e), as long as
        # each block stays >= ~1 MiB.
        if rows >= 2 * _SUBLANE:
            half = (rows // 2 // _SUBLANE) * _SUBLANE
            if half >= _SUBLANE and half * lane * itemsize >= (1 << 20):
                tile_rows = half
    return rows, lane, tile_rows


def identity_pallas_copy(x, *, block_bytes=None):
    """Identity that materializes a fresh output buffer via a tiled VMEM copy."""
    total = int(x.size)
    itemsize = jnp.dtype(x.dtype).itemsize
    if total == 0:
        return x
    if block_bytes is None:
        block_bytes = _target_block_bytes()

    layout = _choose_layout(total, itemsize, block_bytes)
    if layout is None:
        # Not a multiple of 128 lanes: a copy kernel would need padded DMA;
        # Identity is free, so return x (bit-exact semantics).
        return x

    rows, lane, tile_rows = layout
    x2d = x.reshape(rows, lane)                      # lane-dense view, no padding
    grid = (pl.cdiv(rows, tile_rows),)               # ragged tail handled by masking

    y2d = pl.pallas_call(
        _identity_copy_kernel,
        out_shape=jax.ShapeDtypeStruct((rows, lane), x.dtype),
        grid_spec=pltpu.PrefetchScalarGridSpec(
            num_scalar_prefetch=0,
            grid=grid,
            in_specs=[pl.BlockSpec((tile_rows, lane), lambda i: (i, 0))],
            out_specs=pl.BlockSpec((tile_rows, lane), lambda i: (i, 0)),
        ),
        # Lets XLA alias the output onto the input when the caller donates x.
        input_output_aliases={0: 0},
        compiler_params=pltpu.CompilerParams(
            dimension_semantics=("parallel",),
            vmem_limit_bytes=32 * 1024 * 1024,
        ),
    )(x2d)
    return y2d.reshape(x.shape)


if __name__ == "__main__":
    key = jax.random.PRNGKey(0)
    k0, k1, k2 = jax.random.split(key, 3)

    # 1) Module-consistent small NCHW input: default pass-through path.
    x_small = jax.random.normal(k0, (2, 4, 16, 16), dtype=jnp.float32)
    y_small = identity(x_small)
    jax.block_until_ready(y_small)
    assert y_small.shape == x_small.shape and y_small.dtype == x_small.dtype
    assert bool(jnp.all(y_small == x_small))

    # 2) Zero-DMA Pallas-wrapped identity (pl.ANY refs + alias + touch).
    y_noop = identity_pallas(x_small)
    jax.block_until_ready(y_noop)
    assert y_noop.shape == x_small.shape and y_noop.dtype == x_small.dtype
    assert bool(jnp.all(y_noop == x_small))

    # 3) Tiled copy variant, single full-extent block (fresh output buffer).
    x_mid = jax.random.normal(k1, (2, 4, 32, 128), dtype=jnp.float32)
    y_mid = identity_pallas_copy(x_mid)
    jax.block_until_ready(y_mid)
    assert y_mid.shape == x_mid.shape and y_mid.dtype == x_mid.dtype
    assert bool(jnp.all(y_mid == x_mid))

    # 4) Tiled copy variant with a ragged cdiv grid: 15 rows x 4096 lanes in
    #    8-row blocks -> 2 grid steps with a masked tail block.
    x_rag = jax.random.normal(k2, (3, 4, 40, 128), dtype=jnp.float32)
    y_rag = identity_pallas_copy(x_rag, block_bytes=64 * 1024)
    jax.block_until_ready(y_rag)
    assert y_rag.shape == x_rag.shape and y_rag.dtype == x_rag.dtype
    assert bool(jnp.all(y_rag == x_rag))

    print("KERNEL_OK")
</pallas_src>

<mosaic_0001>
module attributes {stable_mosaic.version = 11 : i64} {
  func.func @_identity_noop_kernel(%arg0: memref<2x4x16x16xf32, #tpu.memory_space<any>>, %arg1: memref<2x4x16x16xf32, #tpu.memory_space<any>>) attributes {dimension_semantics = [], scalar_prefetch = 0 : i64, scratch_operands = 0 : i64, tpu.core_type = #tpu.core_type<tc>} {
    return
  }
}

module attributes {stable_mosaic.version = 11 : i64} {
  func.func @_identity_copy_kernel(%arg0: i32, %arg1: memref<8x4096xf32, #tpu.memory_space<vmem>>, %arg2: memref<8x4096xf32, #tpu.memory_space<vmem>>) attributes {dimension_semantics = [#tpu.dimension_semantics<parallel>], iteration_bounds = array<i64: 1>, scalar_prefetch = 0 : i64, scratch_operands = 0 : i64, tpu.core_type = #tpu.core_type<tc>, window_params = [{transform_indices = @transform_0, window_bounds = array<i64: 8, 4096>}, {transform_indices = @transform_1, window_bounds = array<i64: 8, 4096>}]} {
    %c0 = arith.constant 0 : index
    %c0_0 = arith.constant 0 : index
    %0 = vector.load %arg1[%c0, %c0_0] : memref<8x4096xf32, #tpu.memory_space<vmem>>, vector<8x4096xf32>
    %c0_1 = arith.constant 0 : index
    %c0_2 = arith.constant 0 : index
    %1 = vector.load %arg2[%c0_1, %c0_2] : memref<8x4096xf32, #tpu.memory_space<vmem>>, vector<8x4096xf32>
    tpu.vector_store %arg2[%c0_1, %c0_2], %0 {strides = array<i32>} : memref<8x4096xf32, #tpu.memory_space<vmem>>, vector<8x4096xf32>,
    return
  }
  func.func @transform_0(%arg0: i32) -> (i32, i32) {
    %c0_i32 = arith.constant 0 : i32
    %c0_i32_0 = arith.constant 0 : i32
    return %arg0, %c0_i32 : i32, i32
  }
  func.func @transform_1(%arg0: i32) -> (i32, i32) {
    %c0_i32 = arith.constant 0 : i32
    %c0_i32_0 = arith.constant 0 : i32
    return %arg0, %c0_i32 : i32, i32
  }
}

</mosaic_0001>

<bundles_post_ra>
// kernel: tpu_custom_call.1
= control target key start
LH: loop header
LB: loop body
LE: loop exit
PB: predicated region body
PF: predicated region fallthrough
CT: control target
= control target key end

     0   :  { %s16_s0 = inlined_call_operand.hbm [shape: f32[2,4,16,16], index: 0, kind: input, shape index: {}, may-alias: {0,1}]   ;;  %s17_s1 = inlined_call_operand.hbm [shape: f32[2,4,16,16], index: 1, kind: output, shape index: {}, may-alias: {0,1}]  }

// kernel: tpu_custom_call.1
= control target key start
LH: loop header
LB: loop body
LE: loop exit
PB: predicated region body
PF: predicated region fallthrough
CT: control target
= control target key end

     0   :  { %6 = vsyncpa [#allocation3], 0  ;;  %s176_s0 = inlined_call_operand.hbm [shape: f32[8,4096], index: 0, kind: input, shape index: {}, may-alias: {0,1}]   ;;  %s177_s1 = inlined_call_operand.hbm [shape: f32[8,4096], index: 1, kind: output, shape index: {}, may-alias: {0,1}]  }
   0x1   :  { %7 = vsyncpa [#allocation4], 0  ;;  %s13_s8 = sshll.u32 %s176_s0, 4  ;;  %s158_s9 = smov [#allocation2]   ;;  %s14_s8 = int_to_ptr.hbm [resolvable:$true] %s13_s8 }
   0x2   :  { %s15_s10 = sshll.u32 %s158_s9, 4  ;;  %s16_s10 = int_to_ptr.vmem [resolvable:$true] %s15_s10 }
   0x3   :  { %18 = dma.hbm_to_vmem [thread:$0]  %s14_s8, 4096, %s16_s10, [#allocation3]  }
   0x4   :  { %154 = dma.done.wait [#allocation3], 4096  }
   0x5   :  { %155 = vsyncadd [#allocation3], 4294963200  ;;  %v23_v0 = vld [vmem:[#allocation2] sm:$0xff]  ;;  %v24_v1 = vld [vmem:[#allocation2 + $0x8] sm:$0xff]  ;;  %s159_s0 = smov [#allocation5]   ;;  %s94_s14 = sshll.u32 %s177_s1, 4  ;;  %s95_s14 = int_to_ptr.hbm [resolvable:$true] %s94_s14 }
   0x6   :  { %v25_v2 = vld [vmem:[#allocation2 + $0x10] sm:$0xff]  ;;  %55 = vst [vmem:[#allocation5] sm:$0xff] %v23_v0  ;;  %v26_v3 = vld [vmem:[#allocation2 + $0x18] sm:$0xff]  ;;  %v27_v4 = vld [vmem:[#allocation2 + $0x20] sm:$0xff]  ;;  %s92_s11 = sshll.u32 %s159_s0, 4  ;;  %s93_s11 = int_to_ptr.vmem [resolvable:$true] %s92_s11 }
   0x7   :  { %56 = vst [vmem:[#allocation5 + $0x8] sm:$0xff] %v24_v1  ;;  %v28_v5 = vld [vmem:[#allocation2 + $0x28] sm:$0xff]  ;;  %v29_v6 = vld [vmem:[#allocation2 + $0x30] sm:$0xff]  ;;  %v30_v7 = vld [vmem:[#allocation2 + $0x38] sm:$0xff] }
   0x8   :  { %57 = vst [vmem:[#allocation5 + $0x10] sm:$0xff] %v25_v2  ;;  %v31_v8 = vld [vmem:[#allocation2 + $0x40] sm:$0xff]  ;;  %v32_v9 = vld [vmem:[#allocation2 + $0x48] sm:$0xff]  ;;  %v33_v10 = vld [vmem:[#allocation2 + $0x50] sm:$0xff] }
   0x9   :  { %58 = vst [vmem:[#allocation5 + $0x18] sm:$0xff] %v26_v3  ;;  %v34_v11 = vld [vmem:[#allocation2 + $0x58] sm:$0xff]  ;;  %v35_v12 = vld [vmem:[#allocation2 + $0x60] sm:$0xff]  ;;  %v36_v13 = vld [vmem:[#allocation2 + $0x68] sm:$0xff] }
   0xa   :  { %59 = vst [vmem:[#allocation5 + $0x20] sm:$0xff] %v27_v4  ;;  %v37_v14 = vld [vmem:[#allocation2 + $0x70] sm:$0xff]  ;;  %v38_v15 = vld [vmem:[#allocation2 + $0x78] sm:$0xff]  ;;  %v39_v16 = vld [vmem:[#allocation2 + $0x80] sm:$0xff] }
   0xb   :  { %60 = vst [vmem:[#allocation5 + $0x28] sm:$0xff] %v28_v5  ;;  %v40_v17 = vld [vmem:[#allocation2 + $0x88] sm:$0xff]  ;;  %v41_v18 = vld [vmem:[#allocation2 + $0x90] sm:$0xff]  ;;  %v42_v19 = vld [vmem:[#allocation2 + $0x98] sm:$0xff] }
   0xc   :  { %61 = vst [vmem:[#allocation5 + $0x30] sm:$0xff] %v29_v6  ;;  %v43_v20 = vld [vmem:[#allocation2 + $0xa0] sm:$0xff]  ;;  %v44_v21 = vld [vmem:[#allocation2 + $0xa8] sm:$0xff]  ;;  %v45_v22 = vld [vmem:[#allocation2 + $0xb0] sm:$0xff] }
   0xd   :  { %62 = vst [vmem:[#allocation5 + $0x38] sm:$0xff] %v30_v7  ;;  %v46_v23 = vld [vmem:[#allocation2 + $0xb8] sm:$0xff]  ;;  %v47_v24 = vld [vmem:[#allocation2 + $0xc0] sm:$0xff]  ;;  %v48_v25 = vld [vmem:[#allocation2 + $0xc8] sm:$0xff] }
   0xe   :  { %63 = vst [vmem:[#allocation5 + $0x40] sm:$0xff] %v31_v8  ;;  %v49_v26 = vld [vmem:[#allocation2 + $0xd0] sm:$0xff]  ;;  %v50_v27 = vld [vmem:[#allocation2 + $0xd8] sm:$0xff]  ;;  %v51_v28 = vld [vmem:[#allocation2 + $0xe0] sm:$0xff] }
   0xf   :  { %64 = vst [vmem:[#allocation5 + $0x48] sm:$0xff] %v32_v9  ;;  %v52_v29 = vld [vmem:[#allocation2 + $0xe8] sm:$0xff]  ;;  %v53_v30 = vld [vmem:[#allocation2 + $0xf0] sm:$0xff]  ;;  %v54_v31 = vld [vmem:[#allocation2 + $0xf8] sm:$0xff] }
  0x10   :  { %65 = vst [vmem:[#allocation5 + $0x50] sm:$0xff] %v33_v10 }
  0x11   :  { %66 = vst [vmem:[#allocation5 + $0x58] sm:$0xff] %v34_v11 }
  0x12   :  { %67 = vst [vmem:[#allocation5 + $0x60] sm:$0xff] %v35_v12 }
  0x13   :  { %68 = vst [vmem:[#allocation5 + $0x68] sm:$0xff] %v36_v13 }
  0x14   :  { %69 = vst [vmem:[#allocation5 + $0x70] sm:$0xff] %v37_v14 }
  0x15   :  { %70 = vst [vmem:[#allocation5 + $0x78] sm:$0xff] %v38_v15 }
  0x16   :  { %71 = vst [vmem:[#allocation5 + $0x80] sm:$0xff] %v39_v16 }
  0x17   :  { %72 = vst [vmem:[#allocation5 + $0x88] sm:$0xff] %v40_v17 }
  0x18   :  { %73 = vst [vmem:[#allocation5 + $0x90] sm:$0xff] %v41_v18 }
  0x19   :  { %74 = vst [vmem:[#allocation5 + $0x98] sm:$0xff] %v42_v19 }
  0x1a   :  { %75 = vst [vmem:[#allocation5 + $0xa0] sm:$0xff] %v43_v20 }
  0x1b   :  { %76 = vst [vmem:[#allocation5 + $0xa8] sm:$0xff] %v44_v21 }
  0x1c   :  { %77 = vst [vmem:[#allocation5 + $0xb0] sm:$0xff] %v45_v22 }
  0x1d   :  { %78 = vst [vmem:[#allocation5 + $0xb8] sm:$0xff] %v46_v23 }
  0x1e   :  { %79 = vst [vmem:[#allocation5 + $0xc0] sm:$0xff] %v47_v24 }
  0x1f   :  { %80 = vst [vmem:[#allocation5 + $0xc8] sm:$0xff] %v48_v25 }
  0x20   :  { %81 = vst [vmem:[#allocation5 + $0xd0] sm:$0xff] %v49_v26 }
  0x21   :  { %82 = vst [vmem:[#allocation5 + $0xd8] sm:$0xff] %v50_v27 }
  0x22   :  { %83 = vst [vmem:[#allocation5 + $0xe0] sm:$0xff] %v51_v28 }
  0x23   :  { %84 = vst [vmem:[#allocation5 + $0xe8] sm:$0xff] %v52_v29 }
  0x24   :  { %85 = vst [vmem:[#allocation5 + $0xf0] sm:$0xff] %v53_v30 }
  0x25   :  { %86 = vst [vmem:[#allocation5 + $0xf8] sm:$0xff] %v54_v31 }
  0x26   :  { %97 = dma.vmem_to_hbm [thread:$0]  %s93_s11, 4096, %s95_s14, [#allocation4]  }
  0x27   :  { %156 = dma.done.wait [#allocation4], 4096  }
  0x28   :  { %157 = vsyncadd [#allocation4], 4294963200 }
  0x29   :  { %102 = vsyncpa [#allocation3], 1 }
  0x2a   :  { %103 = vsyncpa [#allocation4], 1 }

</bundles_post_ra>
